<compile_context>
chip_gen: v7x
topology: tpu7x:2x2x1
jax: 0.10.0
libtpu: 0.0.40
codegen_flags: <defaults>
</compile_context>

<pallas_src>
import functools

import jax
import jax.numpy as jnp
from jax.experimental import pallas as pl
from jax.experimental.pallas import tpu as pltpu

LANE = 128


def _round_up(n, m):
    return ((n + m - 1) // m) * m


def neuro_fuzzy_kernel(x_ref, c_ref, iw_ref, rw_ref, cons_ref, out_ref):
    # x_ref   : (F_pad, B_TILE)  inputs repeated per membership fn, batch on lanes
    # c_ref   : (F_pad, 1)       flattened membership centers (zero-padded)
    # iw_ref  : (F_pad, 1)       1 / membership widths (padded with 1.0)
    # rw_ref  : (R_pad, F_pad)   rule weights (zero-padded rows/cols)
    # cons_ref: (R_pad, 1)       consequent weights (zero-padded)
    # out_ref : (1, B_TILE)      per-sample scalar outputs, lane-dense
    z = (x_ref[...] - c_ref[...]) * iw_ref[...]                # (F_pad, B_TILE)
    membership = jnp.exp(-0.5 * z * z)                         # (F_pad, B_TILE)
    # MXU matmul: (R_pad, F_pad) @ (F_pad, B_TILE) -> (R_pad, B_TILE)
    rule = jnp.dot(rw_ref[...], membership,
                   preferred_element_type=jnp.float32)
    rule = jax.nn.sigmoid(rule)                                # (R_pad, B_TILE)
    # Final weighted sum on VPU + XLU (M=1 matmul would waste the MXU).
    # Padded rules contribute sigmoid(0)*0 = 0, so the result is exact.
    out_ref[...] = jnp.sum(rule * cons_ref[...], axis=0, keepdims=True)  # (1, B_TILE)


def prepare_params(centers, widths, rule_weights, consequent_weights):
    """One-time parameter layout; hoisted out of the per-call path."""
    num_inputs, num_membership = centers.shape
    num_rules = rule_weights.shape[0]
    F = num_inputs * num_membership
    f_pad = _round_up(F, LANE)
    r_pad = _round_up(num_rules, LANE)

    c_col = centers.astype(jnp.float32).reshape(F, 1)                   # row-major flatten
    iw_col = (1.0 / widths.astype(jnp.float32)).reshape(F, 1)
    c_col = jnp.pad(c_col, ((0, f_pad - F), (0, 0)))                    # pad centers with 0
    iw_col = jnp.pad(iw_col, ((0, f_pad - F), (0, 0)),
                     constant_values=1.0)                               # pad inv-widths with 1
    rw_pad = jnp.pad(rule_weights.astype(jnp.float32),
                     ((0, r_pad - num_rules), (0, f_pad - F)))          # zero pad
    cons_col = jnp.pad(
        consequent_weights.astype(jnp.float32).reshape(num_rules, 1),
        ((0, r_pad - num_rules), (0, 0)))                               # zero pad
    return c_col, iw_col, rw_pad, cons_col


@functools.partial(jax.jit, static_argnames=("num_membership", "max_tile"))
def neuro_fuzzy_forward_batched(x, c, iw, rw, cons, *, num_membership, max_tile=512):
    """x: (B, num_inputs) -> (B,) fuzzy-system outputs."""
    B, num_inputs = x.shape
    F = num_inputs * num_membership
    f_pad = c.shape[0]
    r_pad = rw.shape[0]

    b_tile = max(LANE, min(max_tile, _round_up(B, LANE)))   # multiple of 128 lanes
    b_pad = _round_up(B, b_tile)

    # Only x-dependent glue remains in the per-call path: repeat each input over
    # its membership functions (row f = i*M + m <-> input i) and put the batch
    # on the lane axis. Zero padding is safe: padded membership rows hit zero
    # rule-weight columns, padded batch columns are sliced off below.
    xT = jnp.repeat(x.astype(jnp.float32).T, num_membership, axis=0)    # (F, B)
    xT = jnp.pad(xT, ((0, f_pad - F), (0, b_pad - B)))                  # (f_pad, b_pad)

    out = pl.pallas_call(
        neuro_fuzzy_kernel,
        out_shape=jax.ShapeDtypeStruct((1, b_pad), jnp.float32),
        grid=(b_pad // b_tile,),
        in_specs=[
            pl.BlockSpec((f_pad, b_tile), lambda b: (0, b)),
            pl.BlockSpec((f_pad, 1), lambda b: (0, 0)),
            pl.BlockSpec((f_pad, 1), lambda b: (0, 0)),
            pl.BlockSpec((r_pad, f_pad), lambda b: (0, 0)),
            pl.BlockSpec((r_pad, 1), lambda b: (0, 0)),
        ],
        out_specs=pl.BlockSpec((1, b_tile), lambda b: (0, b)),
        compiler_params=pltpu.CompilerParams(
            dimension_semantics=("parallel",)),
    )(xT, c, iw, rw, cons)
    return out[0, :B]


def neuro_fuzzy_forward(x, c, iw, rw, cons, *, num_membership):
    """Original module semantics: x of shape (num_inputs,) -> scalar."""
    out = neuro_fuzzy_forward_batched(x[None, :], c, iw, rw, cons,
                                      num_membership=num_membership)
    return out[0]


def reference_forward(x, centers, widths, rule_weights, consequent_weights):
    membership = jnp.exp(-0.5 * ((x[:, None] - centers) / widths) ** 2)
    flat = membership.reshape(-1)
    rule = jax.nn.sigmoid(rule_weights @ flat)
    return rule @ consequent_weights


if __name__ == "__main__":
    num_inputs, num_membership, num_rules = 2, 3, 9
    batch = 16

    key = jax.random.PRNGKey(0)
    k_c, k_w, k_rw, k_cons, k_x = jax.random.split(key, 5)

    # Deterministic synthetic parameters (shapes match nn.Module __init__;
    # widths made non-trivial positives to exercise the 1/width path).
    membership_centers = jax.random.normal(k_c, (num_inputs, num_membership), jnp.float32)
    membership_widths = 0.75 + 0.5 * jax.random.uniform(
        k_w, (num_inputs, num_membership), jnp.float32)
    rule_weights = jax.random.normal(
        k_rw, (num_rules, num_inputs * num_membership), jnp.float32)
    consequent_weights = jax.random.normal(k_cons, (num_rules,), jnp.float32)

    # One-time parameter layout (hoisted out of the per-call path).
    c, iw, rw, cons = prepare_params(membership_centers, membership_widths,
                                     rule_weights, consequent_weights)

    # Batched inputs.
    x_batch = jax.random.normal(k_x, (batch, num_inputs), jnp.float32)

    out = neuro_fuzzy_forward_batched(x_batch, c, iw, rw, cons,
                                      num_membership=num_membership)
    out = jax.block_until_ready(out)

    ref = jax.vmap(reference_forward, in_axes=(0, None, None, None, None))(
        x_batch, membership_centers, membership_widths,
        rule_weights, consequent_weights)
    assert out.shape == (batch,)
    assert jnp.allclose(out, ref, atol=1e-5, rtol=1e-5), (out, ref)

    # Single-sample path (exactly the PyTorch module's forward signature).
    out1 = neuro_fuzzy_forward(x_batch[0], c, iw, rw, cons,
                               num_membership=num_membership)
    out1 = jax.block_until_ready(out1)
    ref1 = reference_forward(x_batch[0], membership_centers, membership_widths,
                             rule_weights, consequent_weights)
    assert jnp.allclose(out1, ref1, atol=1e-5, rtol=1e-5), (out1, ref1)

    print("KERNEL_OK")
</pallas_src>

<mosaic_0001>
module attributes {stable_mosaic.version = 11 : i64} {
  func.func @neuro_fuzzy_kernel(%arg0: i32, %arg1: memref<128x128xf32, #tpu.memory_space<vmem>>, %arg2: memref<128x1xf32, #tpu.memory_space<vmem>>, %arg3: memref<128x1xf32, #tpu.memory_space<vmem>>, %arg4: memref<128x128xf32, #tpu.memory_space<vmem>>, %arg5: memref<128x1xf32, #tpu.memory_space<vmem>>, %arg6: memref<1x128xf32, #tpu.memory_space<vmem>>) attributes {dimension_semantics = [#tpu.dimension_semantics<parallel>], iteration_bounds = array<i64: 1>, scalar_prefetch = 0 : i64, scratch_operands = 0 : i64, tpu.core_type = #tpu.core_type<tc>, window_params = [{transform_indices = @transform_0, window_bounds = array<i64: 128, 128>}, {pipeline_mode = #tpu.pipeline_mode<synchronous>, transform_indices = @transform_1, window_bounds = array<i64: 128, 1>}, {pipeline_mode = #tpu.pipeline_mode<synchronous>, transform_indices = @transform_2, window_bounds = array<i64: 128, 1>}, {pipeline_mode = #tpu.pipeline_mode<synchronous>, transform_indices = @transform_3, window_bounds = array<i64: 128, 128>}, {pipeline_mode = #tpu.pipeline_mode<synchronous>, transform_indices = @transform_4, window_bounds = array<i64: 128, 1>}, {transform_indices = @transform_5, window_bounds = array<i64: 1, 128>}]} {
    %c0 = arith.constant 0 : index
    %c0_0 = arith.constant 0 : index
    %0 = vector.load %arg1[%c0, %c0_0] : memref<128x128xf32, #tpu.memory_space<vmem>>, vector<128x128xf32>
    %c0_1 = arith.constant 0 : index
    %c0_2 = arith.constant 0 : index
    %1 = vector.load %arg2[%c0_1, %c0_2] : memref<128x1xf32, #tpu.memory_space<vmem>>, vector<128x1xf32>
    %2 = vector.broadcast %1 : vector<128x1xf32> to vector<128x128xf32>
    %3 = arith.subf %0, %2 : vector<128x128xf32>
    %c0_3 = arith.constant 0 : index
    %c0_4 = arith.constant 0 : index
    %4 = vector.load %arg3[%c0_3, %c0_4] : memref<128x1xf32, #tpu.memory_space<vmem>>, vector<128x1xf32>
    %5 = vector.broadcast %4 : vector<128x1xf32> to vector<128x128xf32>
    %6 = arith.mulf %3, %5 : vector<128x128xf32>
    %cst = arith.constant -5.000000e-01 : f32
    %7 = vector.broadcast %cst : f32 to vector<128x128xf32>
    %8 = arith.mulf %7, %6 : vector<128x128xf32>
    %9 = arith.mulf %8, %6 : vector<128x128xf32>
    %10 = math.exp %9 : vector<128x128xf32>
    %c0_5 = arith.constant 0 : index
    %c0_6 = arith.constant 0 : index
    %11 = vector.load %arg4[%c0_5, %c0_6] : memref<128x128xf32, #tpu.memory_space<vmem>>, vector<128x128xf32>
    %cst_7 = arith.constant dense<0.000000e+00> : vector<128x128xf32>
    %12 = tpu.matmul %11, %10, %cst_7 {dimension_numbers = #tpu.dot_dimension_numbers<[1], [0], [0], [1], [0, 0, 1, 1], [], []>} : vector<128x128xf32>, vector<128x128xf32>, vector<128x128xf32> -> vector<128x128xf32>
    %13 = arith.negf %12 : vector<128x128xf32>
    %14 = math.exp %13 : vector<128x128xf32>
    %cst_8 = arith.constant 1.000000e+00 : f32
    %15 = vector.broadcast %cst_8 : f32 to vector<128x128xf32>
    %16 = arith.addf %15, %14 : vector<128x128xf32>
    %17 = arith.divf %15, %16 : vector<128x128xf32>
    %c0_9 = arith.constant 0 : index
    %c0_10 = arith.constant 0 : index
    %18 = vector.load %arg5[%c0_9, %c0_10] : memref<128x1xf32, #tpu.memory_space<vmem>>, vector<128x1xf32>
    %19 = vector.broadcast %18 : vector<128x1xf32> to vector<128x128xf32>
    %20 = arith.mulf %17, %19 : vector<128x128xf32>
    %cst_11 = arith.constant dense<0.000000e+00> : vector<128xf32>
    %21 = vector.multi_reduction <add>, %20, %cst_11 [0] : vector<128x128xf32> to vector<128xf32>
    %22 = vector.shape_cast %21 : vector<128xf32> to vector<1x128xf32>
    %c0_12 = arith.constant 0 : index
    %c0_13 = arith.constant 0 : index
    %23 = vector.load %arg6[%c0_12, %c0_13] : memref<1x128xf32, #tpu.memory_space<vmem>>, vector<1x128xf32>
    tpu.vector_store %arg6[%c0_12, %c0_13], %22 {strides = array<i32>} : memref<1x128xf32, #tpu.memory_space<vmem>>, vector<1x128xf32>,
    return
  }
  func.func @transform_0(%arg0: i32) -> (i32, i32) {
    %c0_i32 = arith.constant 0 : i32
    %c0_i32_0 = arith.constant 0 : i32
    return %c0_i32, %arg0 : i32, i32
  }
  func.func @transform_1(%arg0: i32) -> (i32, i32) {
    %c0_i32 = arith.constant 0 : i32
    %c0_i32_0 = arith.constant 0 : i32
    %c0_i32_1 = arith.constant 0 : i32
    return %c0_i32, %c0_i32_0 : i32, i32
  }
  func.func @transform_2(%arg0: i32) -> (i32, i32) {
    %c0_i32 = arith.constant 0 : i32
    %c0_i32_0 = arith.constant 0 : i32
    %c0_i32_1 = arith.constant 0 : i32
    return %c0_i32, %c0_i32_0 : i32, i32
  }
  func.func @transform_3(%arg0: i32) -> (i32, i32) {
    %c0_i32 = arith.constant 0 : i32
    %c0_i32_0 = arith.constant 0 : i32
    %c0_i32_1 = arith.constant 0 : i32
    return %c0_i32, %c0_i32_0 : i32, i32
  }
  func.func @transform_4(%arg0: i32) -> (i32, i32) {
    %c0_i32 = arith.constant 0 : i32
    %c0_i32_0 = arith.constant 0 : i32
    %c0_i32_1 = arith.constant 0 : i32
    return %c0_i32, %c0_i32_0 : i32, i32
  }
  func.func @transform_5(%arg0: i32) -> (i32, i32) {
    %c0_i32 = arith.constant 0 : i32
    %c0_i32_0 = arith.constant 0 : i32
    return %c0_i32, %arg0 : i32, i32
  }
}

</mosaic_0001>

<bundles_post_ra>
// kernel: neuro_fuzzy_forward_batched.1
= control target key start
LH: loop header
LB: loop body
LE: loop exit
PB: predicated region body
PF: predicated region fallthrough
CT: control target
= control target key end

     0   :  { %v970_v0 = vmov 0   ;;  %s1244_s2 = inlined_call_operand.vmem [shape: f32[128,1], index: 2, kind: input, shape index: {}]   ;;  %s1245_s1 = inlined_call_operand.vmem [shape: f32[128,1], index: 1, kind: input, shape index: {}]   ;;  %s1246_s4 = inlined_call_operand.vmem [shape: f32[128,1], index: 4, kind: input, shape index: {}]   ;;  %s1247_s3 = inlined_call_operand.vmem [shape: f32[128,128], index: 3, kind: input, shape index: {}]   ;;  %s1248_s0 = inlined_call_operand.vmem [shape: f32[128,128], index: 0, kind: input, shape index: {}]   ;;  %s1249_s5 = inlined_call_operand.vmem [shape: f32[1,128], index: 5, kind: output, shape index: {}]  }
   0x1   :  { %873 = vset.pattern.permute.xlu1 %v970_v0  ;;  %872 = vset.pattern.permute.xlu0 %v970_v0  ;;  %v148_v1 = vld [vmem:[%s1244_s2] sm:$0xff]  ;;  %v149_v3 = vld [vmem:[%s1244_s2 + $0x8] sm:$0xff]  ;;  %v39_v5 = vld [vmem:[%s1245_s1 + $0x18] sm:$0xff] }
   0x2   :  { %v36_v2 = vld [vmem:[%s1245_s1] sm:$0xff]  ;;  %166 = vperm.xlu1 %873, %v148_v1   ;;  %v37_v4 = vld [vmem:[%s1245_s1 + $0x8] sm:$0xff]  ;;  %v38_v6 = vld [vmem:[%s1245_s1 + $0x10] sm:$0xff] }
   0x3   :  { %54 = vperm.xlu0 %872, %v36_v2   ;;  %v151_v7 = vld [vmem:[%s1244_s2 + $0x18] sm:$0xff]  ;;  %v150_v8 = vld [vmem:[%s1244_s2 + $0x10] sm:$0xff]  ;;  %v41_v9 = vld [vmem:[%s1245_s1 + $0x28] sm:$0xff] }
   0x4   :  { %v40_v10 = vld [vmem:[%s1245_s1 + $0x20] sm:$0xff]  ;;  %v153_v11 = vld [vmem:[%s1244_s2 + $0x28] sm:$0xff]  ;;  %v43_v13 = vld [vmem:[%s1245_s1 + $0x38] sm:$0xff] }
   0x5   :  { %v152_v12 = vld [vmem:[%s1244_s2 + $0x20] sm:$0xff]  ;;  %v42_v14 = vld [vmem:[%s1245_s1 + $0x30] sm:$0xff]  ;;  %v155_v15 = vld [vmem:[%s1244_s2 + $0x38] sm:$0xff] }
   0x6   :  { %171 = vperm.xlu1 %873, %v149_v3   ;;  %v154_v16 = vld [vmem:[%s1244_s2 + $0x30] sm:$0xff]  ;;  %v45_v17 = vld [vmem:[%s1245_s1 + $0x48] sm:$0xff]  ;;  %v44_v18 = vld [vmem:[%s1245_s1 + $0x40] sm:$0xff] }
   0x7   :  { %59 = vperm.xlu0 %872, %v37_v4   ;;  %v157_v19 = vld [vmem:[%s1244_s2 + $0x48] sm:$0xff]  ;;  %v156_v20 = vld [vmem:[%s1244_s2 + $0x40] sm:$0xff]  ;;  %v47_v21 = vld [vmem:[%s1245_s1 + $0x58] sm:$0xff] }
   0x8   :  { %v46_v22 = vld [vmem:[%s1245_s1 + $0x50] sm:$0xff]  ;;  %v159_v23 = vld [vmem:[%s1244_s2 + $0x58] sm:$0xff]  ;;  %v49_v25 = vld [vmem:[%s1245_s1 + $0x68] sm:$0xff] }
   0x9   :  { %v158_v24 = vld [vmem:[%s1244_s2 + $0x50] sm:$0xff]  ;;  %v48_v26 = vld [vmem:[%s1245_s1 + $0x60] sm:$0xff]  ;;  %v161_v27 = vld [vmem:[%s1244_s2 + $0x68] sm:$0xff] }
   0xa   :  { %69 = vperm.xlu1 %873, %v39_v5   ;;  %v160_v28 = vld [vmem:[%s1244_s2 + $0x60] sm:$0xff]  ;;  %v51_v29 = vld [vmem:[%s1245_s1 + $0x78] sm:$0xff]  ;;  %v50_v30 = vld [vmem:[%s1245_s1 + $0x70] sm:$0xff] }
   0xb   :  { %64 = vperm.xlu0 %872, %v38_v6   ;;  %v163_v31 = vld [vmem:[%s1244_s2 + $0x78] sm:$0xff]  ;;  %v162_v32 = vld [vmem:[%s1244_s2 + $0x70] sm:$0xff]  ;;  %v582_v33 = vld [vmem:[%s1246_s4 + $0x8] sm:$0xff] }
   0xc   :  { %v581_v34 = vld [vmem:[%s1246_s4] sm:$0xff]  ;;  %v584_v35 = vld [vmem:[%s1246_s4 + $0x18] sm:$0xff]  ;;  %v583_v36 = vld [vmem:[%s1246_s4 + $0x10] sm:$0xff] }
   0xd   :  { %v586_v37 = vld [vmem:[%s1246_s4 + $0x28] sm:$0xff]  ;;  %v585_v38 = vld [vmem:[%s1246_s4 + $0x20] sm:$0xff]  ;;  %v588_v39 = vld [vmem:[%s1246_s4 + $0x38] sm:$0xff] }
   0xe   :  { %181 = vperm.xlu1 %873, %v151_v7   ;;  %v587_v40 = vld [vmem:[%s1246_s4 + $0x30] sm:$0xff]  ;;  %v590_v41 = vld [vmem:[%s1246_s4 + $0x48] sm:$0xff]  ;;  %v589_v42 = vld [vmem:[%s1246_s4 + $0x40] sm:$0xff] }
   0xf   :  { %176 = vperm.xlu0 %872, %v150_v8   ;;  %v592_v43 = vld [vmem:[%s1246_s4 + $0x58] sm:$0xff]  ;;  %v591_v44 = vld [vmem:[%s1246_s4 + $0x50] sm:$0xff]  ;;  %v324_v45 = vld [vmem:[%s1247_s3] sm:$0xff] }
  0x10   :  { %v332_v46 = vld [vmem:[%s1247_s3 + $0x40] sm:$0xff]  ;;  %v594_v47 = vld [vmem:[%s1246_s4 + $0x68] sm:$0xff]  ;;  %799 = vmatprep.mubr.f32.mxu0 %v324_v45  ;;  %v596_v49 = vld [vmem:[%s1246_s4 + $0x78] sm:$0xff] }
  0x11   :  { %v593_v48 = vld [vmem:[%s1246_s4 + $0x60] sm:$0xff]  ;;  %811 = vmatprep.mubr.f32.mxu1 %v332_v46  ;;  %v595_v50 = vld [vmem:[%s1246_s4 + $0x70] sm:$0xff]  ;;  %v21_v55 = vld [vmem:[%s1248_s0 + $0x8] sm:$0xff] }
  0x12   :  { %79 = vperm.xlu1 %873, %v41_v9   ;;  %v20_v51 = vld [vmem:[%s1248_s0] sm:$0xff]  ;;  %v23_v0 = vld [vmem:[%s1248_s0 + $0x18] sm:$0xff]  ;;  %v22_v2 = vld [vmem:[%s1248_s0 + $0x10] sm:$0xff] }
  0x13   :  { %74 = vperm.xlu0 %872, %v40_v10  }
  0x16   :  { %191 = vperm.xlu1 %873, %v153_v11  }
  0x17   :  { %186 = vperm.xlu0 %872, %v152_v12  }
  0x1a   :  { %89 = vperm.xlu1 %873, %v43_v13  }
  0x1b   :  { %84 = vperm.xlu0 %872, %v42_v14  }
  0x1e   :  { %201 = vperm.xlu1 %873, %v155_v15  }
  0x1f   :  { %196 = vperm.xlu0 %872, %v154_v16   ;;  %v25_v16 = vld [vmem:[%s1248_s0 + $0x28] sm:$0xff] }
  0x22   :  { %99 = vperm.xlu1 %873, %v45_v17  }
  0x23   :  { %94 = vperm.xlu0 %872, %v44_v18   ;;  %v24_v18 = vld [vmem:[%s1248_s0 + $0x20] sm:$0xff] }
  0x26   :  { %211 = vperm.xlu1 %873, %v157_v19  }
  0x27   :  { %206 = vperm.xlu0 %872, %v156_v20  }
  0x2a   :  { %109 = vperm.xlu1 %873, %v47_v21  }
  0x2b   :  { %104 = vperm.xlu0 %872, %v46_v22  }
  0x2e   :  { %221 = vperm.xlu1 %873, %v159_v23  }
  0x2f   :  { %216 = vperm.xlu0 %872, %v158_v24  }
  0x32   :  { %119 = vperm.xlu1 %873, %v49_v25  }
  0x33   :  { %114 = vperm.xlu0 %872, %v48_v26  }
  0x36   :  { %231 = vperm.xlu1 %873, %v161_v27  }
  0x37   :  { %226 = vperm.xlu0 %872, %v160_v28  }
  0x3a   :  { %129 = vperm.xlu1 %873, %v51_v29  }
  0x3b   :  { %124 = vperm.xlu0 %872, %v50_v30  }
  0x3e   :  { %241 = vperm.xlu1 %873, %v163_v31  }
  0x3f   :  { %236 = vperm.xlu0 %872, %v162_v32  }
  0x42   :  { %604 = vperm.xlu1 %873, %v582_v33   ;;  %v27_v33 = vld [vmem:[%s1248_s0 + $0x38] sm:$0xff] }
  0x43   :  { %599 = vperm.xlu0 %872, %v581_v34  }
  0x46   :  { %614 = vperm.xlu1 %873, %v584_v35   ;;  %v26_v35 = vld [vmem:[%s1248_s0 + $0x30] sm:$0xff] }
  0x47   :  { %609 = vperm.xlu0 %872, %v583_v36  }
  0x4a   :  { %624 = vperm.xlu1 %873, %v586_v37  }
  0x4b   :  { %619 = vperm.xlu0 %872, %v585_v38  }
  0x4e   :  { %634 = vperm.xlu1 %873, %v588_v39  }
  0x4f   :  { %629 = vperm.xlu0 %872, %v587_v40  }
  0x52   :  { %644 = vperm.xlu1 %873, %v590_v41  }
  0x53   :  { %639 = vperm.xlu0 %872, %v589_v42  }
  0x56   :  { %654 = vperm.xlu1 %873, %v592_v43  }
  0x57   :  { %649 = vperm.xlu0 %872, %v591_v44  }
  0x5a   :  { %664 = vperm.xlu1 %873, %v594_v47  }
  0x5b   :  { %659 = vperm.xlu0 %872, %v593_v48  }
  0x5e   :  { %674 = vperm.xlu1 %873, %v596_v49  }
  0x5f   :  { %669 = vperm.xlu0 %872, %v595_v50  }
  0x81   :  { %v167_v52 = vpop.permute.xlu1 %166 }
  0x82   :  { %v55_v53 = vpop.permute.xlu0 %54 }
  0x83   :  { %v132_v54 = vsub.f32 %v20_v51, %v55_v53  ;;  %v29_v53 = vld [vmem:[%s1248_s0 + $0x48] sm:$0xff] }
  0x85   :  { %v244_v56 = vmul.f32 %v167_v52, %v132_v54  ;;  %v172_v57 = vpop.permute.xlu1 %171 }
  0x86   :  { %v60_v58 = vpop.permute.xlu0 %59 }
  0x87   :  { %v260_v59 = vmul.f32 -0.5, %v244_v56  ;;  %v133_v60 = vsub.f32 %v21_v55, %v60_v58  ;;  %v28_v55 = vld [vmem:[%s1248_s0 + $0x40] sm:$0xff] }
  0x89   :  { %v276_v61 = vmul.f32 %v260_v59, %v244_v56  ;;  %v245_v62 = vmul.f32 %v172_v57, %v133_v60  ;;  %v70_v63 = vpop.permute.xlu1 %69 }
  0x8a   :  { %v65_v1 = vpop.permute.xlu0 %64  ;;  %v135_v6 = vsub.f32 %v23_v0, %v70_v63 }
  0x8b   :  { %v261_v3 = vmul.f32 -0.5, %v245_v62  ;;  %v292_v4 = vmul.f32 1.442695, %v276_v61  ;;  %v134_v7 = vsub.f32 %v22_v2, %v65_v1 }
  0x8d   :  { %v277_v5 = vmul.f32 %v261_v3, %v245_v62  ;;  %v182_v8 = vpop.permute.xlu1 %181  ;;  %874 = vpow2.f32 %v292_v4 }
  0x8e   :  { %v177_v9 = vpop.permute.xlu0 %176  ;;  %v247_v11 = vmul.f32 %v182_v8, %v135_v6  ;;  %v31_v8 = vld [vmem:[%s1248_s0 + $0x58] sm:$0xff] }
  0x8f   :  { %v294_v10 = vmul.f32 1.442695, %v277_v5  ;;  %v246_v12 = vmul.f32 %v177_v9, %v134_v7 }
  0x90   :  { %v263_v13 = vmul.f32 -0.5, %v247_v11 }
  0x91   :  { %876 = vpow2.f32 %v294_v10  ;;  %v262_v14 = vmul.f32 -0.5, %v246_v12  ;;  %v80_v15 = vpop.permute.xlu1 %79  ;;  %v30_v10 = vld [vmem:[%s1248_s0 + $0x50] sm:$0xff] }
  0x92   :  { %v75_v17 = vpop.permute.xlu0 %74  ;;  %v279_v19 = vmul.f32 %v263_v13, %v247_v11  ;;  %v137_v23 = vsub.f32 %v25_v16, %v80_v15 }
  0x93   :  { %v278_v20 = vmul.f32 %v262_v14, %v246_v12  ;;  %v136_v24 = vsub.f32 %v24_v18, %v75_v17 }
  0x94   :  { %v298_v21 = vmul.f32 1.442695, %v279_v19 }
  0x95   :  { %v296_v22 = vmul.f32 1.442695, %v278_v20  ;;  %v192_v25 = vpop.permute.xlu1 %191 }
  0x96   :  { %v187_v26 = vpop.permute.xlu0 %186  ;;  %878 = vpow2.f32 %v298_v21  ;;  %v249_v27 = vmul.f32 %v192_v25, %v137_v23 }
  0x97   :  { %v248_v28 = vmul.f32 %v187_v26, %v136_v24  ;;  %880 = vpow2.f32 %v296_v22  ;;  %v875_v31 = vpop.eup %874 }
  0x98   :  { %v265_v29 = vmul.f32 -0.5, %v249_v27 }
  0x99   :  { %v264_v30 = vmul.f32 -0.5, %v248_v28  ;;  %v90_v32 = vpop.permute.xlu1 %89 }
  0x9a   :  { %v85_v34 = vpop.permute.xlu0 %84  ;;  %v281_v37 = vmul.f32 %v265_v29, %v249_v27  ;;  %v139_v42 = vsub.f32 %v27_v33, %v90_v32  ;;  %v33_v27 = vld [vmem:[%s1248_s0 + $0x68] sm:$0xff]  ;;  %v32_v29 = vld [vmem:[%s1248_s0 + $0x60] sm:$0xff] }
  0x9b   :  { %v877_v36 = vpop.eup %876  ;;  %v280_v38 = vmul.f32 %v264_v30, %v248_v28  ;;  %v138_v43 = vsub.f32 %v26_v35, %v85_v34 }
  0x9c   :  { %v823_v39 = vpack.c.bf16 %v877_v36, %v875_v31  ;;  %v302_v40 = vmul.f32 1.442695, %v281_v37 }
  0x9d   :  { %v300_v41 = vmul.f32 1.442695, %v280_v38  ;;  %v202_v44 = vpop.permute.xlu1 %201 }
  0x9e   :  { %v197_v45 = vpop.permute.xlu0 %196  ;;  %824 = vmatprep.subr.bf16.mxu0 %v823_v39  ;;  %855 = vmatprep.subr.bf16.mxu1 %v823_v39  ;;  %882 = vpow2.f32 %v302_v40  ;;  %v251_v46 = vmul.f32 %v202_v44, %v139_v42 }
  0x9f   :  { %v250_v47 = vmul.f32 %v197_v45, %v138_v43  ;;  %826 = vmatpush3.bf16.msra.mxu0 %v823_v39  ;;  %863 = vmatpush3.bf16.msra.mxu1 %v823_v39  ;;  %884 = vpow2.f32 %v300_v41 }
  0xa0   :  { %v879_v48 = vpop.eup %878  ;;  %v267_v49 = vmul.f32 -0.5, %v251_v46 }
  0xa1   :  { %v266_v50 = vmul.f32 -0.5, %v250_v47  ;;  %v881_v51 = vpop.eup %880  ;;  %v100_v52 = vpop.permute.xlu1 %99 }
  0xa2   :  { %v95_v54 = vpop.permute.xlu0 %94  ;;  %v283_v56 = vmul.f32 %v267_v49, %v251_v46  ;;  %v827_v58 = vpack.c.bf16 %v879_v48, %v881_v51  ;;  %v141_v61 = vsub.f32 %v29_v53, %v100_v52  ;;  %v35_v46 = vld [vmem:[%s1248_s0 + $0x78] sm:$0xff]  ;;  %v34_v48 = vld [vmem:[%s1248_s0 + $0x70] sm:$0xff] }
  0xa3   :  { %v282_v57 = vmul.f32 %v266_v50, %v250_v47  ;;  %v140_v62 = vsub.f32 %v28_v55, %v95_v54 }
  0xa4   :  { %v306_v59 = vmul.f32 1.442695, %v283_v56  ;;  %828 = vmatprep.subr.bf16.mxu0 %v827_v58  ;;  %856 = vmatprep.subr.bf16.mxu1 %v827_v58 }
  0xa5   :  { %v304_v60 = vmul.f32 1.442695, %v282_v57  ;;  %v212_v63 = vpop.permute.xlu1 %211  ;;  %830 = vmatpush3.bf16.msra.mxu0 %v827_v58  ;;  %864 = vmatpush3.bf16.msra.mxu1 %v827_v58 }
  0xa6   :  { %v207_v0 = vpop.permute.xlu0 %206  ;;  %886 = vpow2.f32 %v306_v59  ;;  %v253_v1 = vmul.f32 %v212_v63, %v141_v61 }
  0xa7   :  { %v252_v2 = vmul.f32 %v207_v0, %v140_v62  ;;  %888 = vpow2.f32 %v304_v60 }
  0xa8   :  { %v883_v3 = vpop.eup %882  ;;  %v269_v4 = vmul.f32 -0.5, %v253_v1 }
  0xa9   :  { %v268_v5 = vmul.f32 -0.5, %v252_v2  ;;  %v885_v6 = vpop.eup %884  ;;  %v110_v7 = vpop.permute.xlu1 %109 }
  0xaa   :  { %v105_v9 = vpop.permute.xlu0 %104  ;;  %v285_v11 = vmul.f32 %v269_v4, %v253_v1  ;;  %v831_v13 = vpack.c.bf16 %v883_v3, %v885_v6  ;;  %v143_v16 = vsub.f32 %v31_v8, %v110_v7 }
  0xab   :  { %v284_v12 = vmul.f32 %v268_v5, %v252_v2  ;;  %v142_v17 = vsub.f32 %v30_v10, %v105_v9 }
  0xac   :  { %v310_v14 = vmul.f32 1.442695, %v285_v11  ;;  %832 = vmatprep.subr.bf16.mxu0 %v831_v13  ;;  %857 = vmatprep.subr.bf16.mxu1 %v831_v13  ;;  %v325_v11 = vld [vmem:[%s1247_s3 + $0x8] sm:$0xff] }
  0xad   :  { %v308_v15 = vmul.f32 1.442695, %v284_v12  ;;  %v222_v18 = vpop.permute.xlu1 %221  ;;  %834 = vmatpush3.bf16.msra.mxu0 %v831_v13  ;;  %865 = vmatpush3.bf16.msra.mxu1 %v831_v13  ;;  %v333_v12 = vld [vmem:[%s1247_s3 + $0x48] sm:$0xff]  ;;  %v326_v13 = vld [vmem:[%s1247_s3 + $0x10] sm:$0xff] }
  0xae   :  { %v217_v19 = vpop.permute.xlu0 %216  ;;  %890 = vpow2.f32 %v310_v14  ;;  %v255_v20 = vmul.f32 %v222_v18, %v143_v16  ;;  %v334_v14 = vld [vmem:[%s1247_s3 + $0x50] sm:$0xff]  ;;  %v335_v16 = vld [vmem:[%s1247_s3 + $0x58] sm:$0xff]  ;;  %v336_v18 = vld [vmem:[%s1247_s3 + $0x60] sm:$0xff] }
  0xaf   :  { %v254_v21 = vmul.f32 %v217_v19, %v142_v17  ;;  %892 = vpow2.f32 %v308_v15  ;;  %v327_v15 = vld [vmem:[%s1247_s3 + $0x18] sm:$0xff]  ;;  %v328_v17 = vld [vmem:[%s1247_s3 + $0x20] sm:$0xff]  ;;  %v329_v19 = vld [vmem:[%s1247_s3 + $0x28] sm:$0xff] }
  0xb0   :  { %v887_v22 = vpop.eup %886  ;;  %v271_v23 = vmul.f32 -0.5, %v255_v20 }
  0xb1   :  { %v270_v24 = vmul.f32 -0.5, %v254_v21  ;;  %v889_v25 = vpop.eup %888  ;;  %v120_v26 = vpop.permute.xlu1 %119 }
  0xb2   :  { %v115_v28 = vpop.permute.xlu0 %114  ;;  %v287_v30 = vmul.f32 %v271_v23, %v255_v20  ;;  %v835_v32 = vpack.c.bf16 %v887_v22, %v889_v25  ;;  %v145_v35 = vsub.f32 %v33_v27, %v120_v26  ;;  %v337_v20 = vld [vmem:[%s1247_s3 + $0x68] sm:$0xff]  ;;  %v338_v22 = vld [vmem:[%s1247_s3 + $0x70] sm:$0xff]  ;;  %v331_v23 = vld [vmem:[%s1247_s3 + $0x38] sm:$0xff] }
  0xb3   :  { %v286_v31 = vmul.f32 %v270_v24, %v254_v21  ;;  %v144_v36 = vsub.f32 %v32_v29, %v115_v28  ;;  %v330_v21 = vld [vmem:[%s1247_s3 + $0x30] sm:$0xff]  ;;  %v339_v24 = vld [vmem:[%s1247_s3 + $0x78] sm:$0xff] }
  0xb4   :  { %v314_v33 = vmul.f32 1.442695, %v287_v30  ;;  %836 = vmatprep.subr.bf16.mxu0 %v835_v32  ;;  %858 = vmatprep.subr.bf16.mxu1 %v835_v32 }
  0xb5   :  { %v312_v34 = vmul.f32 1.442695, %v286_v31  ;;  %v232_v37 = vpop.permute.xlu1 %231  ;;  %838 = vmatpush3.bf16.msra.mxu0 %v835_v32  ;;  %866 = vmatpush3.bf16.msra.mxu1 %v835_v32 }
  0xb6   :  { %v227_v38 = vpop.permute.xlu0 %226  ;;  %894 = vpow2.f32 %v314_v33  ;;  %v257_v39 = vmul.f32 %v232_v37, %v145_v35 }
  0xb7   :  { %v256_v40 = vmul.f32 %v227_v38, %v144_v36  ;;  %896 = vpow2.f32 %v312_v34 }
  0xb8   :  { %v891_v41 = vpop.eup %890  ;;  %v273_v42 = vmul.f32 -0.5, %v257_v39 }
  0xb9   :  { %v272_v43 = vmul.f32 -0.5, %v256_v40  ;;  %v893_v44 = vpop.eup %892  ;;  %v130_v45 = vpop.permute.xlu1 %129 }
  0xba   :  { %v125_v47 = vpop.permute.xlu0 %124  ;;  %v289_v49 = vmul.f32 %v273_v42, %v257_v39  ;;  %v839_v51 = vpack.c.bf16 %v891_v41, %v893_v44  ;;  %v147_v54 = vsub.f32 %v35_v46, %v130_v45 }
  0xbb   :  { %v288_v50 = vmul.f32 %v272_v43, %v256_v40  ;;  %v146_v55 = vsub.f32 %v34_v48, %v125_v47 }
  0xbc   :  { %v318_v52 = vmul.f32 1.442695, %v289_v49  ;;  %840 = vmatprep.subr.bf16.mxu0 %v839_v51  ;;  %859 = vmatprep.subr.bf16.mxu1 %v839_v51 }
  0xbd   :  { %v316_v53 = vmul.f32 1.442695, %v288_v50  ;;  %v242_v56 = vpop.permute.xlu1 %241  ;;  %842 = vmatpush3.bf16.msra.mxu0 %v839_v51  ;;  %867 = vmatpush3.bf16.msra.mxu1 %v839_v51 }
  0xbe   :  { %v237_v57 = vpop.permute.xlu0 %236  ;;  %898 = vpow2.f32 %v318_v52  ;;  %v259_v58 = vmul.f32 %v242_v56, %v147_v54 }
  0xbf   :  { %v258_v59 = vmul.f32 %v237_v57, %v146_v55  ;;  %900 = vpow2.f32 %v316_v53 }
  0xc0   :  { %v895_v60 = vpop.eup %894  ;;  %v275_v61 = vmul.f32 -0.5, %v259_v58 }
  0xc1   :  { %v274_v62 = vmul.f32 -0.5, %v258_v59  ;;  %v897_v63 = vpop.eup %896 }
  0xc2   :  { %v291_v0 = vmul.f32 %v275_v61, %v259_v58  ;;  %v843_v2 = vpack.c.bf16 %v895_v60, %v897_v63 }
  0xc3   :  { %v290_v1 = vmul.f32 %v274_v62, %v258_v59  ;;  %v600_v59 = vpop.permute.xlu0 %599 }
  0xc4   :  { %v322_v3 = vmul.f32 1.442695, %v291_v0  ;;  %844 = vmatprep.subr.bf16.mxu0 %v843_v2  ;;  %860 = vmatprep.subr.bf16.mxu1 %v843_v2  ;;  %v605_v0 = vpop.permute.xlu1 %604 }
  0xc5   :  { %v320_v4 = vmul.f32 1.442695, %v290_v1  ;;  %846 = vmatpush3.bf16.msra.mxu0 %v843_v2  ;;  %868 = vmatpush3.bf16.msra.mxu1 %v843_v2 }
  0xc6   :  { %902 = vpow2.f32 %v322_v3 }
  0xc7   :  { %904 = vpow2.f32 %v320_v4 }
  0xc8   :  { %v899_v5 = vpop.eup %898 }
  0xc9   :  { %v901_v6 = vpop.eup %900 }
  0xca   :  { %v847_v7 = vpack.c.bf16 %v899_v5, %v901_v6  ;;  %v610_v6 = vpop.permute.xlu0 %609 }
  0xcc   :  { %848 = vmatprep.subr.bf16.mxu0 %v847_v7  ;;  %861 = vmatprep.subr.bf16.mxu1 %v847_v7 }
  0xcd   :  { %850 = vmatpush3.bf16.msra.mxu0 %v847_v7  ;;  %869 = vmatpush3.bf16.msra.mxu1 %v847_v7 }
  0xd0   :  { %v903_v8 = vpop.eup %902 }
  0xd1   :  { %v905_v9 = vpop.eup %904 }
  0xd2   :  { %v851_v10 = vpack.c.bf16 %v903_v8, %v905_v9 }
  0xd4   :  { %852 = vmatprep.subr.bf16.mxu0 %v851_v10  ;;  %862 = vmatprep.subr.bf16.mxu1 %v851_v10 }
  0xd5   :  { %854 = vmatpush3.bf16.msra.mxu0 %v851_v10  ;;  %870 = vmatpush3.bf16.msra.mxu1 %v851_v10 }
  0xd8   :  { %800 = vmatmul.mubr.f32.vlgmr.msra.gmra.mrb[0].mxu0 %v325_v11  ;;  %812 = vmatmul.mubr.f32.vlgmr.msra.gmra.mrb[0].mxu1 %v333_v12  ;;  %v615_v11 = vpop.permute.xlu1 %614 }
  0xd9   :  { %802 = vmatprep.mubr.f32.mxu0 %v326_v13  ;;  %814 = vmatprep.mubr.f32.mxu1 %v334_v14 }
  0xdc   :  { %803 = vmatmul.mubr.f32.gmra.mrb[2].mxu0 %v327_v15  ;;  %815 = vmatmul.mubr.f32.gmra.mrb[2].mxu1 %v335_v16 }
  0xdd   :  { %805 = vmatprep.mubr.f32.mxu0 %v328_v17  ;;  %817 = vmatprep.mubr.f32.mxu1 %v336_v18 }
  0xe0   :  { %806 = vmatmul.mubr.f32.gmra.mrb[4].mxu0 %v329_v19  ;;  %818 = vmatmul.mubr.f32.gmra.mrb[4].mxu1 %v337_v20  ;;  %v620_v20 = vpop.permute.xlu0 %619 }
  0xe1   :  { %808 = vmatprep.mubr.f32.mxu0 %v330_v21  ;;  %820 = vmatprep.mubr.f32.mxu1 %v338_v22 }
  0xe4   :  { %809 = vmatmul.mubr.f32.gmra.mrb[6].mxu0 %v331_v23  ;;  %821 = vmatmul.mubr.f32.gmra.mrb[6].mxu1 %v339_v24 }
 0x1ab   :  { %v801_v25 = vpop.f32.mrb[0].mxu0  ;;  %v813_v26 = vpop.f32.mrb[0].mxu1 }
 0x1ac   :  { %v720_v27 = vmul.f32 -1.442695, %v801_v25  ;;  %v406_v28 = vpop.f32.mrb[1].mxu0  ;;  %v446_v29 = vpop.f32.mrb[1].mxu1  ;;  %v728_v62 = vmul.f32 -1.442695, %v813_v26 }
 0x1ad   :  { %v719_v30 = vmul.f32 -1.442695, %v406_v28  ;;  %v727_v60 = vmul.f32 -1.442695, %v446_v29  ;;  %v625_v26 = vpop.permute.xlu1 %624 }
 0x1ae   :  { %906 = vpow2.f32 %v720_v27 }
 0x1af   :  { %v804_v31 = vpop.f32.mrb[2].mxu0  ;;  %v816_v32 = vpop.f32.mrb[2].mxu1  ;;  %908 = vpow2.f32 %v719_v30 }
 0x1b0   :  { %v722_v33 = vmul.f32 -1.442695, %v804_v31  ;;  %v416_v34 = vpop.f32.mrb[3].mxu0  ;;  %v456_v35 = vpop.f32.mrb[3].mxu1  ;;  %v730_v7 = vmul.f32 -1.442695, %v816_v32 }
 0x1b1   :  { %v721_v36 = vmul.f32 -1.442695, %v416_v34  ;;  %v729_v4 = vmul.f32 -1.442695, %v456_v35 }
 0x1b2   :  { %910 = vpow2.f32 %v722_v33 }
 0x1b3   :  { %v807_v37 = vpop.f32.mrb[4].mxu0  ;;  %v819_v38 = vpop.f32.mrb[4].mxu1  ;;  %912 = vpow2.f32 %v721_v36 }
 0x1b4   :  { %v724_v39 = vmul.f32 -1.442695, %v807_v37  ;;  %v426_v40 = vpop.f32.mrb[5].mxu0  ;;  %v466_v41 = vpop.f32.mrb[5].mxu1  ;;  %v732_v15 = vmul.f32 -1.442695, %v819_v38 }
 0x1b5   :  { %v723_v42 = vmul.f32 -1.442695, %v426_v40  ;;  %v731_v12 = vmul.f32 -1.442695, %v466_v41  ;;  %v630_v38 = vpop.permute.xlu0 %629  ;;  %v635_v41 = vpop.permute.xlu1 %634 }
 0x1b6   :  { %914 = vpow2.f32 %v724_v39 }
 0x1b7   :  { %v810_v43 = vpop.f32.mrb[6].mxu0  ;;  %v822_v44 = vpop.f32.mrb[6].mxu1  ;;  %916 = vpow2.f32 %v723_v42 }
 0x1b8   :  { %v907_v45 = vpop.eup %906  ;;  %v436_v46 = vpop.f32.mrb[7].mxu0  ;;  %v726_v55 = vmul.f32 -1.442695, %v810_v43  ;;  %v734_v27 = vmul.f32 -1.442695, %v822_v44 }
 0x1b9   :  { %v476_v47 = vpop.f32.mrb[7].mxu1  ;;  %v534_v48 = vadd.f32 1.0, %v907_v45  ;;  %v909_v49 = vpop.eup %908  ;;  %v725_v1 = vmul.f32 -1.442695, %v436_v46 }
 0x1ba   :  { %v533_v50 = vadd.f32 1.0, %v909_v49  ;;  %v733_v21 = vmul.f32 -1.442695, %v476_v47  ;;  %v640_v47 = vpop.permute.xlu0 %639 }
 0x1bb   :  { %918 = vrcp.f32 %v534_v48 }
 0x1bc   :  { %v911_v51 = vpop.eup %910  ;;  %920 = vrcp.f32 %v533_v50 }
 0x1bd   :  { %v536_v52 = vadd.f32 1.0, %v911_v51  ;;  %v913_v53 = vpop.eup %912  ;;  %v645_v51 = vpop.permute.xlu1 %644 }
 0x1be   :  { %v535_v54 = vadd.f32 1.0, %v913_v53 }
 0x1bf   :  { %922 = vrcp.f32 %v536_v52 }
 0x1c0   :  { %v915_v56 = vpop.eup %914  ;;  %924 = vrcp.f32 %v535_v54 }
 0x1c1   :  { %v538_v57 = vadd.f32 1.0, %v915_v56  ;;  %v917_v58 = vpop.eup %916  ;;  %926 = vpow2.f32 %v726_v55 }
 0x1c2   :  { %v537_v61 = vadd.f32 1.0, %v917_v58 }
 0x1c3   :  { %928 = vrcp.f32 %v538_v57 }
 0x1c4   :  { %930 = vrcp.f32 %v537_v61 }
 0x1c5   :  { %v919_v63 = vpop.eup %918  ;;  %932 = vpow2.f32 %v727_v60 }
 0x1c6   :  { %v678_v2 = vmul.f32 %v919_v63, %v605_v0  ;;  %v921_v3 = vpop.eup %920  ;;  %934 = vpow2.f32 %v728_v62  ;;  %v655_v63 = vpop.permute.xlu1 %654 }
 0x1c7   :  { %v677_v5 = vmul.f32 %v921_v3, %v600_v59  ;;  %936 = vpow2.f32 %v725_v1  ;;  %v650_v59 = vpop.permute.xlu0 %649 }
 0x1c8   :  { %938 = vpow2.f32 %v729_v4 }
 0x1c9   :  { %v923_v8 = vpop.eup %922  ;;  %v693_v9 = vadd.f32 %v678_v2, %v677_v5  ;;  %940 = vpow2.f32 %v730_v7 }
 0x1ca   :  { %v925_v10 = vpop.eup %924  ;;  %v680_v17 = vmul.f32 %v923_v8, %v615_v11  ;;  %942 = vpow2.f32 %v731_v12 }
 0x1cb   :  { %v679_v13 = vmul.f32 %v925_v10, %v610_v6  ;;  %v927_v14 = vpop.eup %926  ;;  %944 = vpow2.f32 %v732_v15  ;;  %v660_v6 = vpop.permute.xlu0 %659 }
 0x1cc   :  { %v540_v24 = vadd.f32 1.0, %v927_v14  ;;  %946 = vpow2.f32 %v733_v21  ;;  %v665_v10 = vpop.permute.xlu1 %664 }
 0x1cd   :  { %v929_v16 = vpop.eup %928  ;;  %v694_v18 = vadd.f32 %v693_v9, %v679_v13 }
 0x1ce   :  { %v931_v19 = vpop.eup %930  ;;  %v682_v29 = vmul.f32 %v929_v16, %v625_v26  ;;  %948 = vrcp.f32 %v540_v24 }
 0x1cf   :  { %v681_v22 = vmul.f32 %v931_v19, %v620_v20  ;;  %v695_v23 = vadd.f32 %v694_v18, %v680_v17  ;;  %v933_v25 = vpop.eup %932  ;;  %950 = vpow2.f32 %v734_v27  ;;  %v670_v17 = vpop.permute.xlu0 %669 }
 0x1d0   :  { %v935_v28 = vpop.eup %934  ;;  %v541_v32 = vadd.f32 1.0, %v933_v25  ;;  %v675_v20 = vpop.permute.xlu1 %674 }
 0x1d1   :  { %v696_v30 = vadd.f32 %v695_v23, %v681_v22  ;;  %v937_v31 = vpop.eup %936  ;;  %v542_v36 = vadd.f32 1.0, %v935_v28 }
 0x1d2   :  { %v539_v33 = vadd.f32 1.0, %v937_v31  ;;  %v939_v35 = vpop.eup %938 }
 0x1d3   :  { %v697_v34 = vadd.f32 %v696_v30, %v682_v29  ;;  %v941_v37 = vpop.eup %940  ;;  %v543_v39 = vadd.f32 1.0, %v939_v35 }
 0x1d4   :  { %952 = vrcp.f32 %v539_v33  ;;  %v943_v40 = vpop.eup %942  ;;  %v544_v42 = vadd.f32 1.0, %v941_v37 }
 0x1d5   :  { %954 = vrcp.f32 %v541_v32  ;;  %v945_v43 = vpop.eup %944  ;;  %v545_v44 = vadd.f32 1.0, %v943_v40 }
 0x1d6   :  { %956 = vrcp.f32 %v542_v36  ;;  %v947_v45 = vpop.eup %946  ;;  %v546_v48 = vadd.f32 1.0, %v945_v43 }
 0x1d7   :  { %958 = vrcp.f32 %v543_v39  ;;  %v547_v52 = vadd.f32 1.0, %v947_v45 }
 0x1d8   :  { %v949_v46 = vpop.eup %948  ;;  %960 = vrcp.f32 %v544_v42 }
 0x1d9   :  { %v951_v49 = vpop.eup %950  ;;  %962 = vrcp.f32 %v545_v44  ;;  %v684_v56 = vmul.f32 %v949_v46, %v635_v41 }
 0x1da   :  { %964 = vrcp.f32 %v546_v48  ;;  %v548_v55 = vadd.f32 1.0, %v951_v49 }
 0x1db   :  { %966 = vrcp.f32 %v547_v52 }
 0x1dc   :  { %968 = vrcp.f32 %v548_v55 }
 0x1de   :  { %v953_v50 = vpop.eup %952 }
 0x1df   :  { %v683_v53 = vmul.f32 %v953_v50, %v630_v38  ;;  %v955_v54 = vpop.eup %954 }
 0x1e0   :  { %v957_v58 = vpop.eup %956  ;;  %v685_v60 = vmul.f32 %v955_v54, %v640_v47 }
 0x1e1   :  { %v698_v57 = vadd.f32 %v697_v34, %v683_v53  ;;  %v959_v62 = vpop.eup %958  ;;  %v686_v0 = vmul.f32 %v957_v58, %v645_v51 }
 0x1e2   :  { %v961_v2 = vpop.eup %960  ;;  %v687_v3 = vmul.f32 %v959_v62, %v650_v59 }
 0x1e3   :  { %v699_v61 = vadd.f32 %v698_v57, %v684_v56  ;;  %v963_v5 = vpop.eup %962  ;;  %v688_v7 = vmul.f32 %v961_v2, %v655_v63 }
 0x1e4   :  { %v965_v9 = vpop.eup %964  ;;  %v689_v11 = vmul.f32 %v963_v5, %v660_v6 }
 0x1e5   :  { %v700_v1 = vadd.f32 %v699_v61, %v685_v60  ;;  %v967_v13 = vpop.eup %966  ;;  %v690_v14 = vmul.f32 %v965_v9, %v665_v10 }
 0x1e6   :  { %v969_v16 = vpop.eup %968  ;;  %v691_v18 = vmul.f32 %v967_v13, %v670_v17 }
 0x1e7   :  { %v701_v4 = vadd.f32 %v700_v1, %v686_v0  ;;  %v692_v21 = vmul.f32 %v969_v16, %v675_v20 }
 0x1e9   :  { %v702_v8 = vadd.f32 %v701_v4, %v687_v3 }
 0x1eb   :  { %v703_v12 = vadd.f32 %v702_v8, %v688_v7 }
 0x1ed   :  { %v704_v15 = vadd.f32 %v703_v12, %v689_v11 }
 0x1ef   :  { %v705_v19 = vadd.f32 %v704_v15, %v690_v14 }
 0x1f1   :  { %v706_v22 = vadd.f32 %v705_v19, %v691_v18 }
 0x1f3   :  { %v707_v23 = vadd.f32 %v706_v22, %v692_v21 }
 0x1f5   :  { %v708_v24 = vrot.slane %v707_v23, 4 }
 0x1f7   :  { %v709_v25 = vadd.f32 %v708_v24, %v707_v23 }
 0x1f9   :  { %v710_v26 = vrot.slane %v709_v25, 2 }
 0x1fb   :  { %v711_v27 = vadd.f32 %v710_v26, %v709_v25 }
 0x1fd   :  { %v712_v28 = vrot.slane %v711_v27, 1 }
 0x1ff   :  { %v713_v29 = vadd.f32 %v712_v28, %v711_v27 }
 0x201   :  { %714 = vst [vmem:[%s1249_s5] sm:$0x1] %v713_v29 }

</bundles_post_ra>
